<compile_context>
chip_gen: v7x
topology: tpu7x:2x2x1
jax: 0.10.0
libtpu: 0.0.40
codegen_flags: <defaults>
</compile_context>

<pallas_src>
import functools

import jax
import jax.numpy as jnp
from jax.experimental import pallas as pl
from jax.experimental.pallas import tpu as pltpu


def mlp_kernel(x_ref,
               w1_ref, b1_ref,
               w2_ref, b2_ref,
               w3_ref, b3_ref,
               w4_ref, b4_ref,
               o_ref,
               *, num_subtiles):
    """Fused 4-layer MLP forward for one batch tile.

    The tile is split into `num_subtiles` independent row sub-blocks; their
    dependency chains only share the (read-only, VMEM-resident) weights, so the
    scheduler can interleave MXU dots of one chain with the VPU epilogue
    (bias + ReLU + bf16 cast) of the other. No intermediate touches HBM.
    """
    tm = x_ref.shape[0]
    sub = tm // num_subtiles
    w_refs = (w1_ref, w2_ref, w3_ref, w4_ref)
    b_refs = (b1_ref, b2_ref, b3_ref, b4_ref)
    n_layers = len(w_refs)

    hs = [x_ref[pl.ds(s * sub, sub), :].astype(jnp.bfloat16)
          for s in range(num_subtiles)]

    for layer in range(n_layers):
        w = w_refs[layer][...]          # bf16 [in, out], resident in VMEM
        b = b_refs[layer][...]          # f32 [1, out]
        # MXU pushes for all sub-blocks back-to-back ...
        accs = [jnp.dot(h, w, preferred_element_type=jnp.float32) for h in hs]
        # ... then the VPU epilogues. relu(cast(x)) == cast(relu(x)) bit-exactly,
        # so the ReLU runs in bf16 (cheaper on v6e/v7x; still correct on v5e).
        if layer < n_layers - 1:
            hs = [jnp.maximum((acc + b).astype(jnp.bfloat16), 0) for acc in accs]
        else:
            hs = [acc + b for acc in accs]          # final layer: no ReLU

    for s in range(num_subtiles):
        o_ref[pl.ds(s * sub, sub), :] = hs[s].astype(o_ref.dtype)


def _round_up(n, m):
    return ((n + m - 1) // m) * m


def _ceil_div(a, b):
    return -(-a // b)


def _vmem_limit_bytes(tm, dims, x_itemsize, out_itemsize):
    # Weights/biases (count the pipeline's second buffer even though constant-indexed).
    wb = sum(dims[i] * dims[i + 1] * 2 + dims[i + 1] * 4
             for i in range(len(dims) - 1)) * 2
    # Double-buffered x / out tiles.
    io = (tm * dims[0] * x_itemsize + tm * dims[-1] * out_itemsize) * 2
    # Live intermediates: f32 accumulator + bf16 copy at the widest layer.
    act = tm * max(dims) * (4 + 2)
    est = wb + io + act
    # 2x headroom; floor 16 MiB, cap 48 MiB (stays inside v7x's 64 MiB VMEM).
    return int(min(48 << 20, max(16 << 20, 2 * est)))


@functools.partial(jax.jit, static_argnames=("tile_m",))
def fully_connected_forward(x, params, tile_m=1024):
    """x: [B, input_dim] f32 (or bf16 for the v6e low-HBM-traffic path);
    params: list of (W [in,out] bf16, b [1,out] f32)."""
    B, in_dim = x.shape
    dims = [in_dim] + [w.shape[1] for w, _ in params]
    out_dim = dims[-1]

    # ---- Batch tiling --------------------------------------------------------
    # * big default tile (tile_m=1024) amortizes the ~0.35us per-step overhead;
    # * balanced tiles minimize dead padded rows on the last step;
    # * keep >= 2 grid steps once B is large so both v7x TCs receive batch tiles.
    num_steps = max(1, _ceil_div(B, tile_m))
    if B >= 512:
        num_steps = max(num_steps, 2)
    tm = _round_up(_ceil_div(B, num_steps), 8)
    if tm >= 32:
        tm = _round_up(tm, 16)   # so the tile splits into two mult-of-8 sub-blocks
    num_subtiles = 2 if (tm % 16 == 0 and tm >= 32) else 1

    b_padded = num_steps * tm
    if b_padded != B:
        x = jnp.pad(x, ((0, b_padded - B), (0, 0)))

    flat_params = []
    in_specs = [pl.BlockSpec((tm, in_dim), lambda i: (i, 0))]
    for w, b in params:
        flat_params.extend([w, b])
        # Constant block index -> weights/biases stay resident in VMEM across grid
        # steps (no per-step DMA). pipeline_mode=pl.Buffered(1) could additionally
        # drop their redundant second buffer, but the ~640 KiB saved is noise.
        in_specs.append(pl.BlockSpec(w.shape, lambda i: (0, 0)))
        in_specs.append(pl.BlockSpec(b.shape, lambda i: (0, 0)))

    vmem_limit = _vmem_limit_bytes(tm, dims, x.dtype.itemsize, x.dtype.itemsize)

    out = pl.pallas_call(
        functools.partial(mlp_kernel, num_subtiles=num_subtiles),
        out_shape=jax.ShapeDtypeStruct((b_padded, out_dim), x.dtype),
        grid=(num_steps,),
        in_specs=in_specs,
        out_specs=pl.BlockSpec((tm, out_dim), lambda i: (i, 0)),
        compiler_params=pltpu.CompilerParams(
            # Independent batch tiles: "parallel" allows TC sharding on v7x.
            # (pltpu.CORE_PARALLEL is an option there, but kept off for v5e/v6e
            # portability.)
            dimension_semantics=("parallel",),
            vmem_limit_bytes=vmem_limit,
        ),
    )(x, *flat_params)

    return out[:B] if b_padded != B else out


def init_params(key, input_dim=128, output_dim=128, hidden_dims=(256, 512, 256)):
    """Xavier-normal weights (std = sqrt(2/(fan_in+fan_out))), zero biases.

    Matches nn.init.xavier_normal_ + constant_(bias, 0) in the PyTorch module.
    Weights stored [in_dim, out_dim] in bf16 (MXU-native, half DMA bytes); biases f32.
    """
    dims = [input_dim] + list(hidden_dims) + [output_dim]
    params = []
    for i in range(len(dims) - 1):
        key, sub = jax.random.split(key)
        fan_in, fan_out = dims[i], dims[i + 1]
        std = (2.0 / (fan_in + fan_out)) ** 0.5
        w = std * jax.random.normal(sub, (fan_in, fan_out), dtype=jnp.float32)
        b = jnp.zeros((1, fan_out), dtype=jnp.float32)
        params.append((w.astype(jnp.bfloat16), b))
    return params


def reference_forward_f32(x, params):
    """Pure-f32 reference (PyTorch module semantics) for loose accuracy checking."""
    h = x
    for i, (w, b) in enumerate(params):
        h = h @ w.astype(jnp.float32) + b
        if i < len(params) - 1:
            h = jnp.maximum(h, 0.0)
    return h


def reference_forward_mixed(x, params):
    """Plain-JAX reference mimicking the kernel's dtype path (bf16 dots, f32 acc)."""
    h = x
    for i, (w, b) in enumerate(params):
        h = jnp.dot(h.astype(jnp.bfloat16), w.astype(jnp.bfloat16),
                    preferred_element_type=jnp.float32) + b
        if i < len(params) - 1:
            h = jnp.maximum(h, 0.0)
    return h


def _max_rel_err(a, b):
    return float(jnp.max(jnp.abs(a - b)) / (jnp.max(jnp.abs(b)) + 1e-6))


if __name__ == "__main__":
    key = jax.random.PRNGKey(0)
    k_params, k_x1, k_x2 = jax.random.split(key, 3)

    input_dim, output_dim = 128, 128
    hidden_dims = (256, 512, 256)
    params = init_params(k_params, input_dim, output_dim, hidden_dims)

    # Case 1: small batch (8 rows -> single grid step, single sub-block).
    x_small = jax.random.normal(k_x1, (8, input_dim), dtype=jnp.float32)
    out_small = jax.block_until_ready(fully_connected_forward(x_small, params))
    assert out_small.shape == (8, output_dim), out_small.shape
    assert _max_rel_err(out_small, reference_forward_mixed(x_small, params)) < 2e-3, \
        "mismatch vs mixed-precision reference (small batch)"
    assert _max_rel_err(out_small, reference_forward_f32(x_small, params)) < 5e-2, \
        "mismatch vs f32 reference (small batch)"

    # Case 2: non-multiple batch -> balanced tile (208 rows, 8 pad rows),
    # two interleaved M sub-blocks, pad-and-slice path.
    x_big = jax.random.normal(k_x2, (200, input_dim), dtype=jnp.float32)
    out_big = jax.block_until_ready(fully_connected_forward(x_big, params))
    assert out_big.shape == (200, output_dim), out_big.shape
    assert _max_rel_err(out_big, reference_forward_mixed(x_big, params)) < 2e-3, \
        "mismatch vs mixed-precision reference (batch 200)"
    assert _max_rel_err(out_big, reference_forward_f32(x_big, params)) < 5e-2, \
        "mismatch vs f32 reference (batch 200)"

    print("KERNEL_OK")
</pallas_src>

<mosaic_0001>
module attributes {stable_mosaic.version = 11 : i64} {
  func.func @mlp_kernel(%arg0: i32, %arg1: memref<8x128xf32, #tpu.memory_space<vmem>>, %arg2: memref<128x256xbf16, #tpu.memory_space<vmem>>, %arg3: memref<1x256xf32, #tpu.memory_space<vmem>>, %arg4: memref<256x512xbf16, #tpu.memory_space<vmem>>, %arg5: memref<1x512xf32, #tpu.memory_space<vmem>>, %arg6: memref<512x256xbf16, #tpu.memory_space<vmem>>, %arg7: memref<1x256xf32, #tpu.memory_space<vmem>>, %arg8: memref<256x128xbf16, #tpu.memory_space<vmem>>, %arg9: memref<1x128xf32, #tpu.memory_space<vmem>>, %arg10: memref<8x128xf32, #tpu.memory_space<vmem>>) attributes {dimension_semantics = [#tpu.dimension_semantics<parallel>], iteration_bounds = array<i64: 1>, scalar_prefetch = 0 : i64, scratch_operands = 0 : i64, tpu.core_type = #tpu.core_type<tc>, window_params = [{transform_indices = @transform_0, window_bounds = array<i64: 8, 128>}, {pipeline_mode = #tpu.pipeline_mode<synchronous>, transform_indices = @transform_1, window_bounds = array<i64: 128, 256>}, {pipeline_mode = #tpu.pipeline_mode<synchronous>, transform_indices = @transform_2, window_bounds = array<i64: 1, 256>}, {pipeline_mode = #tpu.pipeline_mode<synchronous>, transform_indices = @transform_3, window_bounds = array<i64: 256, 512>}, {pipeline_mode = #tpu.pipeline_mode<synchronous>, transform_indices = @transform_4, window_bounds = array<i64: 1, 512>}, {pipeline_mode = #tpu.pipeline_mode<synchronous>, transform_indices = @transform_5, window_bounds = array<i64: 512, 256>}, {pipeline_mode = #tpu.pipeline_mode<synchronous>, transform_indices = @transform_6, window_bounds = array<i64: 1, 256>}, {pipeline_mode = #tpu.pipeline_mode<synchronous>, transform_indices = @transform_7, window_bounds = array<i64: 256, 128>}, {pipeline_mode = #tpu.pipeline_mode<synchronous>, transform_indices = @transform_8, window_bounds = array<i64: 1, 128>}, {transform_indices = @transform_9, window_bounds = array<i64: 8, 128>}]} {
    %c0 = arith.constant 0 : index
    %c0_0 = arith.constant 0 : index
    %0 = vector.load %arg1[%c0, %c0_0] : memref<8x128xf32, #tpu.memory_space<vmem>>, vector<8x128xf32>
    %1 = arith.truncf %0 : vector<8x128xf32> to vector<8x128xbf16>
    %c0_1 = arith.constant 0 : index
    %c0_2 = arith.constant 0 : index
    %2 = vector.load %arg2[%c0_1, %c0_2] : memref<128x256xbf16, #tpu.memory_space<vmem>>, vector<128x256xbf16>
    %c0_3 = arith.constant 0 : index
    %c0_4 = arith.constant 0 : index
    %3 = vector.load %arg3[%c0_3, %c0_4] : memref<1x256xf32, #tpu.memory_space<vmem>>, vector<1x256xf32>
    %cst = arith.constant dense<0.000000e+00> : vector<8x256xf32>
    %4 = tpu.matmul %1, %2, %cst {dimension_numbers = #tpu.dot_dimension_numbers<[1], [0], [0], [1], [0, 0, 1, 1], [], []>} : vector<8x128xbf16>, vector<128x256xbf16>, vector<8x256xf32> -> vector<8x256xf32>
    %5 = vector.broadcast %3 : vector<1x256xf32> to vector<8x256xf32>
    %6 = arith.addf %4, %5 : vector<8x256xf32>
    %7 = arith.truncf %6 : vector<8x256xf32> to vector<8x256xbf16>
    %cst_5 = arith.constant 0.000000e+00 : bf16
    %8 = vector.broadcast %cst_5 : bf16 to vector<8x256xbf16>
    %9 = arith.maximumf %7, %8 : vector<8x256xbf16>
    %c0_6 = arith.constant 0 : index
    %c0_7 = arith.constant 0 : index
    %10 = vector.load %arg4[%c0_6, %c0_7] : memref<256x512xbf16, #tpu.memory_space<vmem>>, vector<256x512xbf16>
    %c0_8 = arith.constant 0 : index
    %c0_9 = arith.constant 0 : index
    %11 = vector.load %arg5[%c0_8, %c0_9] : memref<1x512xf32, #tpu.memory_space<vmem>>, vector<1x512xf32>
    %cst_10 = arith.constant dense<0.000000e+00> : vector<8x512xf32>
    %12 = tpu.matmul %9, %10, %cst_10 {dimension_numbers = #tpu.dot_dimension_numbers<[1], [0], [0], [1], [0, 0, 1, 1], [], []>} : vector<8x256xbf16>, vector<256x512xbf16>, vector<8x512xf32> -> vector<8x512xf32>
    %13 = vector.broadcast %11 : vector<1x512xf32> to vector<8x512xf32>
    %14 = arith.addf %12, %13 : vector<8x512xf32>
    %15 = arith.truncf %14 : vector<8x512xf32> to vector<8x512xbf16>
    %cst_11 = arith.constant 0.000000e+00 : bf16
    %16 = vector.broadcast %cst_11 : bf16 to vector<8x512xbf16>
    %17 = arith.maximumf %15, %16 : vector<8x512xbf16>
    %c0_12 = arith.constant 0 : index
    %c0_13 = arith.constant 0 : index
    %18 = vector.load %arg6[%c0_12, %c0_13] : memref<512x256xbf16, #tpu.memory_space<vmem>>, vector<512x256xbf16>
    %c0_14 = arith.constant 0 : index
    %c0_15 = arith.constant 0 : index
    %19 = vector.load %arg7[%c0_14, %c0_15] : memref<1x256xf32, #tpu.memory_space<vmem>>, vector<1x256xf32>
    %cst_16 = arith.constant dense<0.000000e+00> : vector<8x256xf32>
    %20 = tpu.matmul %17, %18, %cst_16 {dimension_numbers = #tpu.dot_dimension_numbers<[1], [0], [0], [1], [0, 0, 1, 1], [], []>} : vector<8x512xbf16>, vector<512x256xbf16>, vector<8x256xf32> -> vector<8x256xf32>
    %21 = vector.broadcast %19 : vector<1x256xf32> to vector<8x256xf32>
    %22 = arith.addf %20, %21 : vector<8x256xf32>
    %23 = arith.truncf %22 : vector<8x256xf32> to vector<8x256xbf16>
    %cst_17 = arith.constant 0.000000e+00 : bf16
    %24 = vector.broadcast %cst_17 : bf16 to vector<8x256xbf16>
    %25 = arith.maximumf %23, %24 : vector<8x256xbf16>
    %c0_18 = arith.constant 0 : index
    %c0_19 = arith.constant 0 : index
    %26 = vector.load %arg8[%c0_18, %c0_19] : memref<256x128xbf16, #tpu.memory_space<vmem>>, vector<256x128xbf16>
    %c0_20 = arith.constant 0 : index
    %c0_21 = arith.constant 0 : index
    %27 = vector.load %arg9[%c0_20, %c0_21] : memref<1x128xf32, #tpu.memory_space<vmem>>, vector<1x128xf32>
    %cst_22 = arith.constant dense<0.000000e+00> : vector<8x128xf32>
    %28 = tpu.matmul %25, %26, %cst_22 {dimension_numbers = #tpu.dot_dimension_numbers<[1], [0], [0], [1], [0, 0, 1, 1], [], []>} : vector<8x256xbf16>, vector<256x128xbf16>, vector<8x128xf32> -> vector<8x128xf32>
    %29 = vector.broadcast %27 : vector<1x128xf32> to vector<8x128xf32>
    %30 = arith.addf %28, %29 : vector<8x128xf32>
    %c0_23 = arith.constant 0 : index
    %c0_24 = arith.constant 0 : index
    %31 = vector.load %arg10[%c0_23, %c0_24] : memref<8x128xf32, #tpu.memory_space<vmem>>, vector<8x128xf32>
    tpu.vector_store %arg10[%c0_23, %c0_24], %30 {strides = array<i32>} : memref<8x128xf32, #tpu.memory_space<vmem>>, vector<8x128xf32>,
    return
  }
  func.func @transform_0(%arg0: i32) -> (i32, i32) {
    %c0_i32 = arith.constant 0 : i32
    %c0_i32_0 = arith.constant 0 : i32
    return %arg0, %c0_i32 : i32, i32
  }
  func.func @transform_1(%arg0: i32) -> (i32, i32) {
    %c0_i32 = arith.constant 0 : i32
    %c0_i32_0 = arith.constant 0 : i32
    %c0_i32_1 = arith.constant 0 : i32
    return %c0_i32, %c0_i32_0 : i32, i32
  }
  func.func @transform_2(%arg0: i32) -> (i32, i32) {
    %c0_i32 = arith.constant 0 : i32
    %c0_i32_0 = arith.constant 0 : i32
    %c0_i32_1 = arith.constant 0 : i32
    return %c0_i32, %c0_i32_0 : i32, i32
  }
  func.func @transform_3(%arg0: i32) -> (i32, i32) {
    %c0_i32 = arith.constant 0 : i32
    %c0_i32_0 = arith.constant 0 : i32
    %c0_i32_1 = arith.constant 0 : i32
    return %c0_i32, %c0_i32_0 : i32, i32
  }
  func.func @transform_4(%arg0: i32) -> (i32, i32) {
    %c0_i32 = arith.constant 0 : i32
    %c0_i32_0 = arith.constant 0 : i32
    %c0_i32_1 = arith.constant 0 : i32
    return %c0_i32, %c0_i32_0 : i32, i32
  }
  func.func @transform_5(%arg0: i32) -> (i32, i32) {
    %c0_i32 = arith.constant 0 : i32
    %c0_i32_0 = arith.constant 0 : i32
    %c0_i32_1 = arith.constant 0 : i32
    return %c0_i32, %c0_i32_0 : i32, i32
  }
  func.func @transform_6(%arg0: i32) -> (i32, i32) {
    %c0_i32 = arith.constant 0 : i32
    %c0_i32_0 = arith.constant 0 : i32
    %c0_i32_1 = arith.constant 0 : i32
    return %c0_i32, %c0_i32_0 : i32, i32
  }
  func.func @transform_7(%arg0: i32) -> (i32, i32) {
    %c0_i32 = arith.constant 0 : i32
    %c0_i32_0 = arith.constant 0 : i32
    %c0_i32_1 = arith.constant 0 : i32
    return %c0_i32, %c0_i32_0 : i32, i32
  }
  func.func @transform_8(%arg0: i32) -> (i32, i32) {
    %c0_i32 = arith.constant 0 : i32
    %c0_i32_0 = arith.constant 0 : i32
    %c0_i32_1 = arith.constant 0 : i32
    return %c0_i32, %c0_i32_0 : i32, i32
  }
  func.func @transform_9(%arg0: i32) -> (i32, i32) {
    %c0_i32 = arith.constant 0 : i32
    %c0_i32_0 = arith.constant 0 : i32
    return %arg0, %c0_i32 : i32, i32
  }
}

</mosaic_0001>

<bundles_post_ra>
// kernel: fully_connected_forward.1
= control target key start
LH: loop header
LB: loop body
LE: loop exit
PB: predicated region body
PF: predicated region fallthrough
CT: control target
= control target key end

     0   :  { %14 = vsyncpa [#allocation3], 0  ;;  %s2181_s0 = inlined_call_operand.hbm [shape: f32[8,128], index: 0, kind: input, shape index: {}]   ;;  %s2182_s1 = inlined_call_operand.hbm [shape: bf16[128,256], index: 1, kind: input, shape index: {}]   ;;  %s2183_s2 = inlined_call_operand.vmem [shape: f32[1,256], index: 2, kind: input, shape index: {}]   ;;  %s2184_s3 = inlined_call_operand.hbm [shape: bf16[256,512], index: 3, kind: input, shape index: {}]   ;;  %s2185_s4 = inlined_call_operand.vmem [shape: f32[1,512], index: 4, kind: input, shape index: {}]   ;;  %s2186_s5 = inlined_call_operand.hbm [shape: bf16[512,256], index: 5, kind: input, shape index: {}]   ;;  %s2187_s6 = inlined_call_operand.vmem [shape: f32[1,256], index: 6, kind: input, shape index: {}]   ;;  %s2188_s7 = inlined_call_operand.hbm [shape: bf16[256,128], index: 7, kind: input, shape index: {}]   ;;  %s2189_s8 = inlined_call_operand.vmem [shape: f32[1,128], index: 8, kind: input, shape index: {}]   ;;  %s2190_s9 = inlined_call_operand.hbm [shape: f32[8,128], index: 9, kind: output, shape index: {}]  }
   0x1   :  { %15 = vsyncpa [#allocation6], 0 }
   0x2   :  { %16 = vsyncpa [#allocation9], 0 }
   0x3   :  { %17 = vsyncpa [#allocation4], 0  ;;  %s2000_s30 = smov [#allocation5]   ;;  %s1860_s13 = scalar_lea.hbm %s2182_s1, 2048 }
   0x4   :  { %s33_s10 = sshll.u32 %s2000_s30, 4  ;;  %p1861_p0 = scmp.ne.s32.totalorder %s2182_s1, %s1860_s13  ;;  %s34_s10 = int_to_ptr.vmem [resolvable:$true] %s33_s10 }
   0x5   :  { %p1864_p1 = scmp.lt.u32.totalorder %s1860_s13, %s2182_s1 }
   0x7   :  { %p1866_p2 = pnand %p1864_p1, %p1861_p0 }
   0x9   :  { %1869 = shalt.err (!%p1866_p2)
}
   0xa   :  { %s1870_s18 = scalar_lea.vmem %s34_s10, 2048  ;;  %p1875_p4 = scmp.lt.s32.totalorder %s34_s10, %s34_s10 }
   0xb   :  { %p1871_p3 = scmp.ne.s32.totalorder %s34_s10, %s1870_s18  ;;  %p1876_p5 = scmp.lt.s32.totalorder %s1870_s18, %s1870_s18 }
   0xd   :  { %p1877_p6 = por %p1876_p5, %p1875_p4 }
   0xf   :  { %p1878_p7 = pnand %p1877_p6, %p1871_p3 }
  0x11   :  { %1881 = shalt.err (!%p1878_p7)
}
  0x12   :  { %s2001_s19 = smov 128   ;;  %s2002_s20 = smov 8  }
  0x13   :  { %39 = dma.hbm_to_vmem [thread:$0]  %s2182_s1, 2048, %s34_s10, [#allocation6], %s2001_s19, %s2001_s19, %s2002_s20  }
  0x14   :  { %s2003_s23 = smov [#allocation8]   ;;  %s2004_s25 = smov [#allocation2]  }
  0x15   :  { %s61_s24 = sshll.u32 %s2003_s23, 4  ;;  %s24_s26 = sshll.u32 %s2004_s25, 4  ;;  %s62_s24 = int_to_ptr.vmem [resolvable:$true] %s61_s24  ;;  %s25_s26 = int_to_ptr.vmem [resolvable:$true] %s24_s26 }
  0x16   :  { %s1882_s29 = scalar_lea.hbm %s2186_s5, 8192 }
  0x17   :  { %p1883_p8 = scmp.ne.s32.totalorder %s2186_s5, %s1882_s29  ;;  %p1886_p9 = scmp.lt.u32.totalorder %s1882_s29, %s2186_s5 }
  0x19   :  { %p1888_p10 = pnand %p1886_p9, %p1883_p8 }
  0x1b   :  { %1891 = shalt.err (!%p1888_p10)
}
  0x1c   :  { %s1892_s1 = scalar_lea.vmem %s62_s24, 8192  ;;  %p1897_p12 = scmp.lt.s32.totalorder %s62_s24, %s62_s24 }
  0x1d   :  { %p1893_p11 = scmp.ne.s32.totalorder %s62_s24, %s1892_s1  ;;  %p1898_p13 = scmp.lt.s32.totalorder %s1892_s1, %s1892_s1 }
  0x1f   :  { %p1899_p0 = por %p1898_p13, %p1897_p12 }
  0x21   :  { %p1900_p1 = pnand %p1899_p0, %p1893_p11 }
  0x23   :  { %1903 = shalt.err (!%p1900_p1)
}
  0x24   :  { %67 = dma.hbm_to_vmem [thread:$0]  %s2186_s5, 8192, %s62_s24, [#allocation9], %s2001_s19, %s2001_s19, %s2002_s20  }
  0x25   :  { %s1904_s17 = scalar_lea.hbm %s2181_s0, 128 }
  0x26   :  { %p1905_p2 = scmp.ne.s32.totalorder %s2181_s0, %s1904_s17  ;;  %p1908_p3 = scmp.lt.u32.totalorder %s1904_s17, %s2181_s0 }
  0x28   :  { %p1910_p4 = pnand %p1908_p3, %p1905_p2 }
  0x2a   :  { %1913 = shalt.err (!%p1910_p4)
}
  0x2b   :  { %s1914_s25 = scalar_lea.vmem %s25_s26, 128  ;;  %p1919_p6 = scmp.lt.s32.totalorder %s25_s26, %s25_s26 }
  0x2c   :  { %p1915_p5 = scmp.ne.s32.totalorder %s25_s26, %s1914_s25  ;;  %p1920_p7 = scmp.lt.s32.totalorder %s1914_s25, %s1914_s25 }
  0x2e   :  { %p1921_p8 = por %p1920_p7, %p1919_p6 }
  0x30   :  { %p1922_p9 = pnand %p1921_p8, %p1915_p5 }
  0x32   :  { %1925 = shalt.err (!%p1922_p9)
}
  0x33   :  { %27 = dma.hbm_to_vmem [thread:$0]  %s2181_s0, 128, %s25_s26, [#allocation3]  }
  0x34   :  { %s2005_s20 = smov [#allocation7]   ;;  %s1926_s29 = scalar_lea.hbm %s2184_s3, 8192 }
  0x35   :  { %s47_s24 = sshll.u32 %s2005_s20, 4  ;;  %p1927_p10 = scmp.ne.s32.totalorder %s2184_s3, %s1926_s29  ;;  %s48_s24 = int_to_ptr.vmem [resolvable:$true] %s47_s24 }
  0x36   :  { %p1930_p11 = scmp.lt.u32.totalorder %s1926_s29, %s2184_s3 }
  0x38   :  { %p1932_p12 = pnand %p1930_p11, %p1927_p10 }
  0x3a   :  { %1935 = shalt.err (!%p1932_p12)
}
  0x3b   :  { %s1936_s1 = scalar_lea.vmem %s48_s24, 8192  ;;  %p1941_p0 = scmp.lt.s32.totalorder %s48_s24, %s48_s24 }
  0x3c   :  { %p1937_p13 = scmp.ne.s32.totalorder %s48_s24, %s1936_s1  ;;  %p1942_p1 = scmp.lt.s32.totalorder %s1936_s1, %s1936_s1 }
  0x3e   :  { %p1943_p2 = por %p1942_p1, %p1941_p0 }
  0x40   :  { %p1944_p3 = pnand %p1943_p2, %p1937_p13 }
  0x42   :  { %1947 = shalt.err (!%p1944_p3)
}
  0x43   :  { %s2006_s0 = smov 256   ;;  %s2007_s26 = smov 16  }
  0x44   :  { %53 = dma.hbm_to_vmem [thread:$0]  %s2184_s3, 8192, %s48_s24, [#allocation6], %s2006_s0, %s2006_s0, %s2007_s26  }
  0x45   :  { %s2008_s15 = smov [#allocation10]   ;;  %s1948_s21 = scalar_lea.hbm %s2188_s7, 2048 }
  0x46   :  { %s75_s16 = sshll.u32 %s2008_s15, 4  ;;  %p1949_p4 = scmp.ne.s32.totalorder %s2188_s7, %s1948_s21  ;;  %s76_s16 = int_to_ptr.vmem [resolvable:$true] %s75_s16 }
  0x47   :  { %p1952_p5 = scmp.lt.u32.totalorder %s1948_s21, %s2188_s7 }
  0x49   :  { %p1954_p6 = pnand %p1952_p5, %p1949_p4 }
  0x4b   :  { %1957 = shalt.err (!%p1954_p6)
}
  0x4c   :  { %s1958_s19 = scalar_lea.vmem %s76_s16, 2048  ;;  %p1963_p8 = scmp.lt.s32.totalorder %s76_s16, %s76_s16 }
  0x4d   :  { %p1959_p7 = scmp.ne.s32.totalorder %s76_s16, %s1958_s19  ;;  %p1964_p9 = scmp.lt.s32.totalorder %s1958_s19, %s1958_s19 }
  0x4f   :  { %p1965_p10 = por %p1964_p9, %p1963_p8 }
  0x51   :  { %p1966_p11 = pnand %p1965_p10, %p1959_p7 }
  0x53   :  { %1969 = shalt.err (!%p1966_p11)
}
  0x54   :  { %s2009_s3 = smov 64   ;;  %s2010_s20 = smov 4  }
  0x55   :  { %81 = dma.hbm_to_vmem [thread:$0]  %s2188_s7, 2048, %s76_s16, [#allocation9], %s2009_s3, %s2009_s3, %s2010_s20  }
  0x56   :  { %1992 = dma.done.wait [#allocation3], 128  }
  0x57   :  { %1993 = vsyncadd [#allocation3], 4294967168 }
  0x58   :  { %1994 = dma.done.wait [#allocation6], 10240  }
  0x59   :  { %1995 = vsyncadd [#allocation6], 4294957056 }
  0x5a   :  { %1996 = dma.done.wait [#allocation9], 10240  }
  0x5b   :  { %1997 = vsyncadd [#allocation9], 4294957056  ;;  %v2011_v0 = vmov 0   ;;  %v1628_v1 = vld [vmem:[#allocation5 + $0x4] ss:$8 sps:$4 sm:$0xff]   ;;  %v100_v26 = vld [vmem:[#allocation2] sm:$0xff] }
  0x5c   :  { %242 = vmatprep.mubr.bf16.mxu0 %v2011_v0  ;;  %v1630_v2 = vld [vmem:[#allocation5] ss:$8 sps:$4 sm:$0xff]   ;;  %210 = vmatprep.subr.bf16.mxu0 %v1628_v1  ;;  %v1631_v3 = vld [vmem:[#allocation5 + $0x14] ss:$8 sps:$4 sm:$0xff]   ;;  %v1633_v4 = vld [vmem:[#allocation5 + $0x10] ss:$8 sps:$4 sm:$0xff]   ;;  %v101_v30 = vpack.c.bf16 %v100_v26, %v100_v26 }
  0x5d   :  { %211 = vmatpush1.bf16.msra.mxu0 %v1630_v2  ;;  %v1634_v5 = vld [vmem:[#allocation5 + $0x24] ss:$8 sps:$4 sm:$0xff]   ;;  %v1636_v6 = vld [vmem:[#allocation5 + $0x20] ss:$8 sps:$4 sm:$0xff]   ;;  %v1637_v7 = vld [vmem:[#allocation5 + $0x34] ss:$8 sps:$4 sm:$0xff]  }
  0x5e   :  { %212 = vmatprep.subr.bf16.mxu0 %v1631_v3  ;;  %v1639_v8 = vld [vmem:[#allocation5 + $0x30] ss:$8 sps:$4 sm:$0xff]   ;;  %v1652_v9 = vld [vmem:[#allocation7 + $0x4] ss:$16 sps:$4 sm:$0xff]   ;;  %v1642_v13 = vld [vmem:[#allocation5 + $0x40] ss:$8 sps:$4 sm:$0xff]  }
  0x5f   :  { %v1640_v10 = vld [vmem:[#allocation5 + $0x44] ss:$8 sps:$4 sm:$0xff]   ;;  %661 = vmatprep.subr.bf16.mxu1 %v1652_v9  ;;  %v1657_v11 = vld [vmem:[#allocation7] ss:$16 sps:$4 sm:$0xff]   ;;  %v1643_v14 = vld [vmem:[#allocation5 + $0x54] ss:$8 sps:$4 sm:$0xff]  }
  0x60   :  { %v1658_v12 = vld [vmem:[#allocation7 + $0x24] ss:$16 sps:$4 sm:$0xff]   ;;  %662 = vmatpush1.bf16.msra.mxu1 %v1657_v11  ;;  %v1663_v15 = vld [vmem:[#allocation7 + $0x20] ss:$16 sps:$4 sm:$0xff]   ;;  %v1656_v27 = vld [vmem:[#allocation7 + $0xc] ss:$16 sps:$4 sm:$0xff]  }
  0x61   :  { %213 = vmatpush1.bf16.msra.mxu0 %v1633_v4  ;;  %663 = vmatprep.subr.bf16.mxu1 %v1658_v12  ;;  %v1664_v16 = vld [vmem:[#allocation7 + $0x44] ss:$16 sps:$4 sm:$0xff]   ;;  %v1645_v17 = vld [vmem:[#allocation5 + $0x50] ss:$8 sps:$4 sm:$0xff]   ;;  %v1648_v21 = vld [vmem:[#allocation5 + $0x60] ss:$8 sps:$4 sm:$0xff]  }
  0x62   :  { %214 = vmatprep.subr.bf16.mxu0 %v1634_v5  ;;  %v1646_v18 = vld [vmem:[#allocation5 + $0x64] ss:$8 sps:$4 sm:$0xff]   ;;  %v1669_v19 = vld [vmem:[#allocation7 + $0x40] ss:$16 sps:$4 sm:$0xff]   ;;  %v1649_v22 = vld [vmem:[#allocation5 + $0x74] ss:$8 sps:$4 sm:$0xff]  }
  0x63   :  { %v1670_v20 = vld [vmem:[#allocation7 + $0x64] ss:$16 sps:$4 sm:$0xff]   ;;  %v1675_v23 = vld [vmem:[#allocation7 + $0x60] ss:$16 sps:$4 sm:$0xff]   ;;  %v1654_v31 = vld [vmem:[#allocation7 + $0x8] ss:$16 sps:$4 sm:$0xff]  }
  0x64   :  { %664 = vmatpush1.bf16.msra.mxu1 %v1663_v15  ;;  %v1676_v24 = vld [vmem:[#allocation7 + $0x84] ss:$16 sps:$4 sm:$0xff]   ;;  %v1651_v25 = vld [vmem:[#allocation5 + $0x70] ss:$8 sps:$4 sm:$0xff]   ;;  %v1662_v32 = vld [vmem:[#allocation7 + $0x2c] ss:$16 sps:$4 sm:$0xff]  }
  0x65   :  { %215 = vmatpush1.bf16.msra.mxu0 %v1636_v6  ;;  %665 = vmatprep.subr.bf16.mxu1 %v1664_v16  ;;  %v1681_v28 = vld [vmem:[#allocation7 + $0x80] ss:$16 sps:$4 sm:$0xff]   ;;  %v1682_v29 = vld [vmem:[#allocation7 + $0xa4] ss:$16 sps:$4 sm:$0xff]   ;;  %v1660_v35 = vld [vmem:[#allocation7 + $0x28] ss:$16 sps:$4 sm:$0xff]  }
  0x66   :  { %216 = vmatprep.subr.bf16.mxu0 %v1637_v7  ;;  %v1687_v33 = vld [vmem:[#allocation7 + $0xa0] ss:$16 sps:$4 sm:$0xff]   ;;  %v1688_v34 = vld [vmem:[#allocation7 + $0xc4] ss:$16 sps:$4 sm:$0xff]   ;;  %v1668_v36 = vld [vmem:[#allocation7 + $0x4c] ss:$16 sps:$4 sm:$0xff]  }
  0x67   :  { %v1693_v37 = vld [vmem:[#allocation7 + $0xc0] ss:$16 sps:$4 sm:$0xff]   ;;  %v1694_v38 = vld [vmem:[#allocation7 + $0xe4] ss:$16 sps:$4 sm:$0xff]   ;;  %v1666_v39 = vld [vmem:[#allocation7 + $0x48] ss:$16 sps:$4 sm:$0xff]  }
  0x68   :  { %666 = vmatpush1.bf16.msra.mxu1 %v1669_v19  ;;  %v1674_v40 = vld [vmem:[#allocation7 + $0x6c] ss:$16 sps:$4 sm:$0xff]   ;;  %v1699_v41 = vld [vmem:[#allocation7 + $0xe0] ss:$16 sps:$4 sm:$0xff]   ;;  %v1700_v42 = vld [vmem:[#allocation7 + $0x104] ss:$16 sps:$4 sm:$0xff]  }
  0x69   :  { %217 = vmatpush1.bf16.msra.mxu0 %v1639_v8  ;;  %667 = vmatprep.subr.bf16.mxu1 %v1670_v20  ;;  %v1672_v43 = vld [vmem:[#allocation7 + $0x68] ss:$16 sps:$4 sm:$0xff]   ;;  %v1680_v44 = vld [vmem:[#allocation7 + $0x8c] ss:$16 sps:$4 sm:$0xff]   ;;  %v1705_v45 = vld [vmem:[#allocation7 + $0x100] ss:$16 sps:$4 sm:$0xff]  }
  0x6a   :  { %218 = vmatprep.subr.bf16.mxu0 %v1640_v10  ;;  %v1706_v46 = vld [vmem:[#allocation7 + $0x124] ss:$16 sps:$4 sm:$0xff]   ;;  %v1678_v47 = vld [vmem:[#allocation7 + $0x88] ss:$16 sps:$4 sm:$0xff]   ;;  %v1711_v48 = vld [vmem:[#allocation7 + $0x120] ss:$16 sps:$4 sm:$0xff]  }
  0x6b   :  { %v1686_v49 = vld [vmem:[#allocation7 + $0xac] ss:$16 sps:$4 sm:$0xff]   ;;  %v1712_v50 = vld [vmem:[#allocation7 + $0x144] ss:$16 sps:$4 sm:$0xff]   ;;  %v1684_v51 = vld [vmem:[#allocation7 + $0xa8] ss:$16 sps:$4 sm:$0xff]  }
  0x6c   :  { %668 = vmatpush1.bf16.msra.mxu1 %v1675_v23  ;;  %v1717_v52 = vld [vmem:[#allocation7 + $0x140] ss:$16 sps:$4 sm:$0xff]   ;;  %v1692_v53 = vld [vmem:[#allocation7 + $0xcc] ss:$16 sps:$4 sm:$0xff]   ;;  %v1718_v54 = vld [vmem:[#allocation7 + $0x164] ss:$16 sps:$4 sm:$0xff]  }
  0x6d   :  { %219 = vmatpush1.bf16.msra.mxu0 %v1642_v13  ;;  %669 = vmatprep.subr.bf16.mxu1 %v1676_v24  ;;  %v1690_v55 = vld [vmem:[#allocation7 + $0xc8] ss:$16 sps:$4 sm:$0xff]   ;;  %v1723_v56 = vld [vmem:[#allocation7 + $0x160] ss:$16 sps:$4 sm:$0xff]   ;;  %v1698_v57 = vld [vmem:[#allocation7 + $0xec] ss:$16 sps:$4 sm:$0xff]  }
  0x6e   :  { %220 = vmatprep.subr.bf16.mxu0 %v1643_v14  ;;  %v1724_v58 = vld [vmem:[#allocation7 + $0x184] ss:$16 sps:$4 sm:$0xff]   ;;  %v1696_v59 = vld [vmem:[#allocation7 + $0xe8] ss:$16 sps:$4 sm:$0xff]   ;;  %v1729_v60 = vld [vmem:[#allocation7 + $0x180] ss:$16 sps:$4 sm:$0xff]  }
  0x6f   :  { %v1704_v61 = vld [vmem:[#allocation7 + $0x10c] ss:$16 sps:$4 sm:$0xff]   ;;  %v1730_v62 = vld [vmem:[#allocation7 + $0x1a4] ss:$16 sps:$4 sm:$0xff]   ;;  %v1702_v63 = vld [vmem:[#allocation7 + $0x108] ss:$16 sps:$4 sm:$0xff]  }
  0x70   :  { %670 = vmatpush1.bf16.msra.mxu1 %v1681_v28  ;;  %v1735_v1 = vld [vmem:[#allocation7 + $0x1a0] ss:$16 sps:$4 sm:$0xff]   ;;  %v1710_v2 = vld [vmem:[#allocation7 + $0x12c] ss:$16 sps:$4 sm:$0xff]   ;;  %v1708_v3 = vld [vmem:[#allocation7 + $0x128] ss:$16 sps:$4 sm:$0xff]  }
  0x71   :  { %221 = vmatpush1.bf16.msra.mxu0 %v1645_v17  ;;  %671 = vmatprep.subr.bf16.mxu1 %v1682_v29  ;;  %v1716_v4 = vld [vmem:[#allocation7 + $0x14c] ss:$16 sps:$4 sm:$0xff]   ;;  %v1714_v5 = vld [vmem:[#allocation7 + $0x148] ss:$16 sps:$4 sm:$0xff]   ;;  %v1736_v12 = vld [vmem:[#allocation7 + $0x1c4] ss:$16 sps:$4 sm:$0xff]  }
  0x72   :  { %222 = vmatprep.subr.bf16.mxu0 %v1646_v18  ;;  %v1722_v6 = vld [vmem:[#allocation7 + $0x16c] ss:$16 sps:$4 sm:$0xff]   ;;  %v1720_v7 = vld [vmem:[#allocation7 + $0x168] ss:$16 sps:$4 sm:$0xff]   ;;  %v1741_v15 = vld [vmem:[#allocation7 + $0x1c0] ss:$16 sps:$4 sm:$0xff]  }
  0x73   :  { %v1728_v8 = vld [vmem:[#allocation7 + $0x18c] ss:$16 sps:$4 sm:$0xff]   ;;  %v1726_v9 = vld [vmem:[#allocation7 + $0x188] ss:$16 sps:$4 sm:$0xff]   ;;  %v1742_v16 = vld [vmem:[#allocation7 + $0x1e4] ss:$16 sps:$4 sm:$0xff]  }
  0x74   :  { %672 = vmatpush1.bf16.msra.mxu1 %v1687_v33  ;;  %v1734_v10 = vld [vmem:[#allocation7 + $0x1ac] ss:$16 sps:$4 sm:$0xff]   ;;  %v1732_v11 = vld [vmem:[#allocation7 + $0x1a8] ss:$16 sps:$4 sm:$0xff]   ;;  %v1747_v19 = vld [vmem:[#allocation7 + $0x1e0] ss:$16 sps:$4 sm:$0xff]  }
  0x75   :  { %223 = vmatpush1.bf16.msra.mxu0 %v1648_v21  ;;  %673 = vmatprep.subr.bf16.mxu1 %v1688_v34  ;;  %v1740_v13 = vld [vmem:[#allocation7 + $0x1cc] ss:$16 sps:$4 sm:$0xff]   ;;  %v1738_v14 = vld [vmem:[#allocation7 + $0x1c8] ss:$16 sps:$4 sm:$0xff]   ;;  %v120_v21 = vlaneseq  ;;  %s2012_s12 = smov [#allocation11]  }
  0x76   :  { %224 = vmatprep.subr.bf16.mxu0 %v1649_v22  ;;  %v1746_v17 = vld [vmem:[#allocation7 + $0x1ec] ss:$16 sps:$4 sm:$0xff]   ;;  %v1744_v18 = vld [vmem:[#allocation7 + $0x1e8] ss:$16 sps:$4 sm:$0xff]   ;;  %s1415_s13 = sshll.u32 %s2012_s12, 4  ;;  %s1416_s13 = int_to_ptr.vmem [resolvable:$true] %s1415_s13 }
  0x77   :  { %v1750_v20 = vld [vmem:[#allocation8 + $0x4] ss:$8 sps:$4 sm:$0xff]   ;;  %v2124_v22 = vshrl.u32 %v120_v21, 7  ;;  %v118_v24 = vld [vmem:[%s2183_s2] sm:$0x3]  ;;  %s1970_s1 = scalar_lea.vmem %s1416_s13, 128  ;;  %p1975_p13 = scmp.lt.s32.totalorder %s1416_s13, %s1416_s13 }
  0x78   :  { %674 = vmatpush1.bf16.msra.mxu1 %v1693_v37  ;;  %v1748_v37 = vld [vmem:[#allocation8] ss:$8 sps:$4 sm:$0xff]   ;;  %p1971_p12 = scmp.ne.s32.totalorder %s1416_s13, %s1970_s1  ;;  %p1976_p0 = scmp.lt.s32.totalorder %s1970_s1, %s1970_s1 }
  0x79   :  { %225 = vmatpush1.bf16.msra.mxu0 %v1651_v25  ;;  %675 = vmatprep.subr.bf16.mxu1 %v1694_v38  ;;  %v2127_v23 = vsub.s32 0, %v2124_v22  ;;  %v2133_v25 = vsub.s32 1, %v2124_v22 }
  0x7a   :  { %702 = vmatprep.subr.bf16.mxu0 %v1656_v27  ;;  %p1977_p1 = por %p1976_p0, %p1975_p13 }
  0x7b   :  { %v123_v26 = vrot.slane %v118_v24, %v2127_v23  ;;  %v127_v27 = vrot.slane %v118_v24, %v2133_v25 }
  0x7c   :  { %243 = vmatmul.mubr.bf16.vlgmr.msra.gmra.mrb[0].mxu0 %v101_v30  ;;  %676 = vmatpush1.bf16.msra.mxu1 %v1699_v41  ;;  %v1756_v41 = vld [vmem:[#allocation8 + $0x24] ss:$8 sps:$4 sm:$0xff]   ;;  %p1978_p2 = pnand %p1977_p1, %p1971_p12 }
  0x7d   :  { %703 = vmatpush1.bf16.msra.mxu0 %v1654_v31  ;;  %677 = vmatprep.subr.bf16.mxu1 %v1700_v42  ;;  %v1754_v42 = vld [vmem:[#allocation8 + $0x20] ss:$8 sps:$4 sm:$0xff]  }
  0x7e   :  { %704 = vmatprep.subr.bf16.mxu0 %v1662_v32 }
  0x80   :  { %678 = vmatpush1.bf16.msra.mxu1 %v1705_v45  ;;  %v1762_v45 = vld [vmem:[#allocation8 + $0x44] ss:$8 sps:$4 sm:$0xff]  }
  0x81   :  { %705 = vmatpush1.bf16.msra.mxu0 %v1660_v35  ;;  %679 = vmatprep.subr.bf16.mxu1 %v1706_v46  ;;  %v1760_v46 = vld [vmem:[#allocation8 + $0x40] ss:$8 sps:$4 sm:$0xff]  }
  0x82   :  { %706 = vmatprep.subr.bf16.mxu0 %v1668_v36 }
  0x84   :  { %680 = vmatpush1.bf16.msra.mxu1 %v1711_v48  ;;  %v1763_v48 = vld [vmem:[#allocation8 + $0x50] ss:$8 sps:$4 sm:$0xff]  }
  0x85   :  { %707 = vmatpush1.bf16.msra.mxu0 %v1666_v39  ;;  %681 = vmatprep.subr.bf16.mxu1 %v1712_v50  ;;  %v1753_v39 = vld [vmem:[#allocation8 + $0x14] ss:$8 sps:$4 sm:$0xff]   ;;  %v1766_v50 = vld [vmem:[#allocation8 + $0x60] ss:$8 sps:$4 sm:$0xff]  }
  0x86   :  { %708 = vmatprep.subr.bf16.mxu0 %v1674_v40  ;;  %v1751_v40 = vld [vmem:[#allocation8 + $0x10] ss:$8 sps:$4 sm:$0xff]  }
  0x88   :  { %682 = vmatpush1.bf16.msra.mxu1 %v1717_v52  ;;  %v1769_v52 = vld [vmem:[#allocation8 + $0x70] ss:$8 sps:$4 sm:$0xff]  }
  0x89   :  { %709 = vmatpush1.bf16.msra.mxu0 %v1672_v43  ;;  %683 = vmatprep.subr.bf16.mxu1 %v1718_v54  ;;  %v1759_v43 = vld [vmem:[#allocation8 + $0x34] ss:$8 sps:$4 sm:$0xff]   ;;  %v1772_v54 = vld [vmem:[#allocation8 + $0x80] ss:$8 sps:$4 sm:$0xff]  }
  0x8a   :  { %710 = vmatprep.subr.bf16.mxu0 %v1680_v44  ;;  %v1757_v44 = vld [vmem:[#allocation8 + $0x30] ss:$8 sps:$4 sm:$0xff]  }
  0x8c   :  { %684 = vmatpush1.bf16.msra.mxu1 %v1723_v56  ;;  %v1775_v56 = vld [vmem:[#allocation8 + $0x90] ss:$8 sps:$4 sm:$0xff]  }
  0x8d   :  { %711 = vmatpush1.bf16.msra.mxu0 %v1678_v47  ;;  %685 = vmatprep.subr.bf16.mxu1 %v1724_v58  ;;  %v1765_v47 = vld [vmem:[#allocation8 + $0x54] ss:$8 sps:$4 sm:$0xff]   ;;  %v1778_v58 = vld [vmem:[#allocation8 + $0xa0] ss:$8 sps:$4 sm:$0xff]  }
  0x8e   :  { %712 = vmatprep.subr.bf16.mxu0 %v1686_v49  ;;  %v1768_v49 = vld [vmem:[#allocation8 + $0x64] ss:$8 sps:$4 sm:$0xff]  }
  0x90   :  { %686 = vmatpush1.bf16.msra.mxu1 %v1729_v60  ;;  %v1781_v60 = vld [vmem:[#allocation8 + $0xb0] ss:$8 sps:$4 sm:$0xff]  }
  0x91   :  { %713 = vmatpush1.bf16.msra.mxu0 %v1684_v51  ;;  %687 = vmatprep.subr.bf16.mxu1 %v1730_v62  ;;  %v1771_v51 = vld [vmem:[#allocation8 + $0x74] ss:$8 sps:$4 sm:$0xff]   ;;  %v1784_v62 = vld [vmem:[#allocation8 + $0xc0] ss:$8 sps:$4 sm:$0xff]  }
  0x92   :  { %714 = vmatprep.subr.bf16.mxu0 %v1692_v53  ;;  %v1774_v53 = vld [vmem:[#allocation8 + $0x84] ss:$8 sps:$4 sm:$0xff]  }
  0x94   :  { %688 = vmatpush1.bf16.msra.mxu1 %v1735_v1  ;;  %v1787_v1 = vld [vmem:[#allocation8 + $0xd0] ss:$8 sps:$4 sm:$0xff]  }
  0x95   :  { %715 = vmatpush1.bf16.msra.mxu0 %v1690_v55  ;;  %689 = vmatprep.subr.bf16.mxu1 %v1736_v12  ;;  %v1777_v55 = vld [vmem:[#allocation8 + $0x94] ss:$8 sps:$4 sm:$0xff]  }
  0x96   :  { %716 = vmatprep.subr.bf16.mxu0 %v1698_v57  ;;  %v1780_v57 = vld [vmem:[#allocation8 + $0xa4] ss:$8 sps:$4 sm:$0xff]   ;;  %v1849_v12 = vld [vmem:[#allocation10 + $0x10] sm:$0xff]  }
  0x98   :  { %690 = vmatpush1.bf16.msra.mxu1 %v1741_v15  ;;  %v1852_v15 = vld [vmem:[#allocation10 + $0x60] sm:$0xff]  }
  0x99   :  { %717 = vmatpush1.bf16.msra.mxu0 %v1696_v59  ;;  %691 = vmatprep.subr.bf16.mxu1 %v1742_v16  ;;  %v1783_v59 = vld [vmem:[#allocation8 + $0xb4] ss:$8 sps:$4 sm:$0xff]   ;;  %v1853_v16 = vld [vmem:[#allocation10 + $0x20] sm:$0xff]  }
  0x9a   :  { %718 = vmatprep.subr.bf16.mxu0 %v1704_v61  ;;  %v1786_v61 = vld [vmem:[#allocation8 + $0xc4] ss:$8 sps:$4 sm:$0xff]  }
  0x9c   :  { %692 = vmatpush1.bf16.msra.mxu1 %v1747_v19  ;;  %v2142_v19 = vld [vmem:[%s2185_s4] sm:$0xf] }
  0x9d   :  { %719 = vmatpush1.bf16.msra.mxu0 %v1702_v63  ;;  %1147 = vmatprep.subr.bf16.mxu1 %v1750_v20  ;;  %v1789_v63 = vld [vmem:[#allocation8 + $0xd4] ss:$8 sps:$4 sm:$0xff]   ;;  %v335_v20 = vsub.s32 3, %v2124_v22  ;;  %v324_v21 = vrot.slane %v2142_v19, %v2127_v23  ;;  %v328_v24 = vrot.slane %v2142_v19, %v2133_v25 }
  0x9e   :  { %720 = vmatprep.subr.bf16.mxu0 %v1710_v2  ;;  %v1792_v2 = vld [vmem:[#allocation8 + $0xe4] ss:$8 sps:$4 sm:$0xff]  }
  0xa1   :  { %721 = vmatpush1.bf16.msra.mxu0 %v1708_v3  ;;  %v1790_v3 = vld [vmem:[#allocation8 + $0xe0] ss:$8 sps:$4 sm:$0xff]  }
  0xa2   :  { %722 = vmatprep.subr.bf16.mxu0 %v1716_v4  ;;  %v1795_v4 = vld [vmem:[#allocation8 + $0xf4] ss:$8 sps:$4 sm:$0xff]  }
  0xa5   :  { %723 = vmatpush1.bf16.msra.mxu0 %v1714_v5  ;;  %v1793_v5 = vld [vmem:[#allocation8 + $0xf0] ss:$8 sps:$4 sm:$0xff]  }
  0xa6   :  { %724 = vmatprep.subr.bf16.mxu0 %v1722_v6  ;;  %v1798_v6 = vld [vmem:[#allocation8 + $0x104] ss:$8 sps:$4 sm:$0xff]  }
  0xa9   :  { %725 = vmatpush1.bf16.msra.mxu0 %v1720_v7  ;;  %v1844_v7 = vld [vmem:[#allocation10 + $0x40] sm:$0xff]  }
  0xaa   :  { %726 = vmatprep.subr.bf16.mxu0 %v1728_v8  ;;  %v1845_v8 = vld [vmem:[#allocation10] sm:$0xff]  }
  0xad   :  { %727 = vmatpush1.bf16.msra.mxu0 %v1726_v9  ;;  %v1846_v9 = vld [vmem:[#allocation10 + $0x48] sm:$0xff]  }
  0xae   :  { %728 = vmatprep.subr.bf16.mxu0 %v1734_v10  ;;  %v1847_v10 = vld [vmem:[#allocation10 + $0x8] sm:$0xff]  }
  0xb1   :  { %729 = vmatpush1.bf16.msra.mxu0 %v1732_v11  ;;  %v1848_v11 = vld [vmem:[#allocation10 + $0x50] sm:$0xff]  }
  0xb2   :  { %730 = vmatprep.subr.bf16.mxu0 %v1740_v13  ;;  %v1850_v13 = vld [vmem:[#allocation10 + $0x58] sm:$0xff]  }
  0xb5   :  { %731 = vmatpush1.bf16.msra.mxu0 %v1738_v14  ;;  %v1851_v14 = vld [vmem:[#allocation10 + $0x18] sm:$0xff]  }
  0xb6   :  { %732 = vmatprep.subr.bf16.mxu0 %v1746_v17  ;;  %v1854_v17 = vld [vmem:[#allocation10 + $0x68] sm:$0xff]  }
  0xb9   :  { %733 = vmatpush1.bf16.msra.mxu0 %v1744_v18  ;;  %v1855_v18 = vld [vmem:[#allocation10 + $0x28] sm:$0xff]  }
  0xba   :  { %1587 = vmatprep.subr.bf16.mxu0 %v1844_v7  ;;  %v1837_v7 = vld [vmem:[#allocation8 + $0x1d4] ss:$8 sps:$4 sm:$0xff]  }
 0x14f   :  { %v244_v28 = vpop.f32.mrb[0].mxu0 }
 0x150   :  { %v245_v29 = vadd.f32 %v244_v28, %v123_v26  ;;  %v246_v30 = vpop.f32.mrb[1].mxu0  ;;  %v336_v26 = vrot.slane %v2142_v19, %v335_v20  ;;  %v815_v20 = vld [vmem:[%s2187_s6] sm:$0x3] }
 0x151   :  { %v247_v31 = vadd.f32 %v246_v30, %v127_v27  ;;  %v248_v32 = vpop.f32.mrb[2].mxu0 }
 0x152   :  { %v251_v33 = vpack.c.bf16 %v245_v29, %v245_v29  ;;  %v249_v34 = vpop.f32.mrb[3].mxu0 }
 0x153   :  { %v252_v35 = vpack.c.bf16 %v247_v31, %v247_v31 }
 0x154   :  { %v253_v38 = vmax.bf16 %v2011_v0, %v251_v33 }
 0x155   :  { %v254_v36 = vmax.bf16 %v2011_v0, %v252_v35 }
 0x157   :  { %693 = vmatprep.mubr.bf16.mxu1 %v254_v36  ;;  %734 = vmatprep.mubr.bf16.mxu0 %v254_v36 }
 0x158   :  { %694 = vmatmul.mubr.bf16.vlgmr.msra.gmra.mrb[0].mxu1 %v253_v38  ;;  %735 = vmatmul.mubr.bf16.vlgmr.msra.gmra.mrb[4].mxu0 %v253_v38 }
 0x159   :  { %1148 = vmatpush1.bf16.msra.mxu1 %v1748_v37  ;;  %1588 = vmatpush3.bf16.msra.mxu0 %v1845_v8  ;;  %v1835_v8 = vld [vmem:[#allocation8 + $0x1d0] ss:$8 sps:$4 sm:$0xff]  }
 0x15a   :  { %1149 = vmatprep.subr.bf16.mxu1 %v1753_v39  ;;  %1589 = vmatprep.subr.bf16.mxu0 %v1846_v9 }
 0x15d   :  { %1150 = vmatpush1.bf16.msra.mxu1 %v1751_v40  ;;  %1590 = vmatpush3.bf16.msra.mxu0 %v1847_v10  ;;  %v1840_v10 = vld [vmem:[#allocation8 + $0x1e4] ss:$8 sps:$4 sm:$0xff]  }
 0x15e   :  { %1151 = vmatprep.subr.bf16.mxu1 %v1756_v41  ;;  %1591 = vmatprep.subr.bf16.mxu0 %v1848_v11  ;;  %v1838_v11 = vld [vmem:[#allocation8 + $0x1e0] ss:$8 sps:$4 sm:$0xff]  }
 0x161   :  { %1152 = vmatpush1.bf16.msra.mxu1 %v1754_v42  ;;  %1592 = vmatpush3.bf16.msra.mxu0 %v1849_v12  ;;  %v1796_v42 = vld [vmem:[#allocation8 + $0x100] ss:$8 sps:$4 sm:$0xff]  }
 0x162   :  { %1153 = vmatprep.subr.bf16.mxu1 %v1759_v43  ;;  %1593 = vmatprep.subr.bf16.mxu0 %v1850_v13  ;;  %v1843_v13 = vld [vmem:[#allocation8 + $0x1f4] ss:$8 sps:$4 sm:$0xff]  }
 0x165   :  { %1154 = vmatpush1.bf16.msra.mxu1 %v1757_v44  ;;  %1594 = vmatpush3.bf16.msra.mxu0 %v1851_v14  ;;  %v1801_v44 = vld [vmem:[#allocation8 + $0x114] ss:$8 sps:$4 sm:$0xff]   ;;  %v1841_v14 = vld [vmem:[#allocation8 + $0x1f0] ss:$8 sps:$4 sm:$0xff]  }
 0x166   :  { %1155 = vmatprep.subr.bf16.mxu1 %v1762_v45  ;;  %1595 = vmatprep.subr.bf16.mxu0 %v1852_v15 }
 0x169   :  { %1156 = vmatpush1.bf16.msra.mxu1 %v1760_v46  ;;  %1596 = vmatpush3.bf16.msra.mxu0 %v1853_v16  ;;  %v1799_v46 = vld [vmem:[#allocation8 + $0x110] ss:$8 sps:$4 sm:$0xff]  }
 0x16a   :  { %1157 = vmatprep.subr.bf16.mxu1 %v1765_v47  ;;  %1597 = vmatprep.subr.bf16.mxu0 %v1854_v17  ;;  %v1804_v47 = vld [vmem:[#allocation8 + $0x124] ss:$8 sps:$4 sm:$0xff]   ;;  %v1856_v16 = vld [vmem:[#allocation10 + $0x70] sm:$0xff]  }
 0x16b   :  { %v1857_v17 = vld [vmem:[#allocation10 + $0x30] sm:$0xff]  }
 0x16d   :  { %1158 = vmatpush1.bf16.msra.mxu1 %v1763_v48  ;;  %1598 = vmatpush3.bf16.msra.mxu0 %v1855_v18  ;;  %v1802_v48 = vld [vmem:[#allocation8 + $0x120] ss:$8 sps:$4 sm:$0xff]   ;;  %v1858_v18 = vld [vmem:[#allocation10 + $0x78] sm:$0xff]  }
 0x16e   :  { %1159 = vmatprep.subr.bf16.mxu1 %v1768_v49  ;;  %v1807_v49 = vld [vmem:[#allocation8 + $0x134] ss:$8 sps:$4 sm:$0xff]   ;;  %1599 = vmatprep.subr.bf16.mxu0 %v1856_v16 }
 0x171   :  { %1160 = vmatpush1.bf16.msra.mxu1 %v1766_v50  ;;  %v1805_v50 = vld [vmem:[#allocation8 + $0x130] ss:$8 sps:$4 sm:$0xff]   ;;  %1600 = vmatpush3.bf16.msra.mxu0 %v1857_v17 }
 0x172   :  { %1161 = vmatprep.subr.bf16.mxu1 %v1771_v51  ;;  %v1810_v51 = vld [vmem:[#allocation8 + $0x144] ss:$8 sps:$4 sm:$0xff]   ;;  %1601 = vmatprep.subr.bf16.mxu0 %v1858_v18 }
 0x175   :  { %1162 = vmatpush1.bf16.msra.mxu1 %v1769_v52  ;;  %v1808_v52 = vld [vmem:[#allocation8 + $0x140] ss:$8 sps:$4 sm:$0xff]  }
 0x176   :  { %1163 = vmatprep.subr.bf16.mxu1 %v1774_v53  ;;  %v1813_v53 = vld [vmem:[#allocation8 + $0x154] ss:$8 sps:$4 sm:$0xff]  }
 0x179   :  { %1164 = vmatpush1.bf16.msra.mxu1 %v1772_v54  ;;  %v1811_v54 = vld [vmem:[#allocation8 + $0x150] ss:$8 sps:$4 sm:$0xff]  }
 0x17a   :  { %1165 = vmatprep.subr.bf16.mxu1 %v1777_v55  ;;  %v1816_v55 = vld [vmem:[#allocation8 + $0x164] ss:$8 sps:$4 sm:$0xff]  }
 0x17d   :  { %1166 = vmatpush1.bf16.msra.mxu1 %v1775_v56  ;;  %v1814_v56 = vld [vmem:[#allocation8 + $0x160] ss:$8 sps:$4 sm:$0xff]  }
 0x17e   :  { %1167 = vmatprep.subr.bf16.mxu1 %v1780_v57  ;;  %v1819_v57 = vld [vmem:[#allocation8 + $0x174] ss:$8 sps:$4 sm:$0xff]  }
 0x181   :  { %1168 = vmatpush1.bf16.msra.mxu1 %v1778_v58  ;;  %v1817_v58 = vld [vmem:[#allocation8 + $0x170] ss:$8 sps:$4 sm:$0xff]  }
 0x182   :  { %1169 = vmatprep.subr.bf16.mxu1 %v1783_v59  ;;  %v1822_v59 = vld [vmem:[#allocation8 + $0x184] ss:$8 sps:$4 sm:$0xff]  }
 0x185   :  { %1170 = vmatpush1.bf16.msra.mxu1 %v1781_v60  ;;  %v1820_v60 = vld [vmem:[#allocation8 + $0x180] ss:$8 sps:$4 sm:$0xff]  }
 0x186   :  { %1171 = vmatprep.subr.bf16.mxu1 %v1786_v61  ;;  %v1825_v61 = vld [vmem:[#allocation8 + $0x194] ss:$8 sps:$4 sm:$0xff]  }
 0x189   :  { %1172 = vmatpush1.bf16.msra.mxu1 %v1784_v62  ;;  %v1823_v62 = vld [vmem:[#allocation8 + $0x190] ss:$8 sps:$4 sm:$0xff]  }
 0x18a   :  { %1173 = vmatprep.subr.bf16.mxu1 %v1789_v63  ;;  %v1828_v63 = vld [vmem:[#allocation8 + $0x1a4] ss:$8 sps:$4 sm:$0xff]  }
 0x18d   :  { %1174 = vmatpush1.bf16.msra.mxu1 %v1787_v1  ;;  %v1826_v1 = vld [vmem:[#allocation8 + $0x1a0] ss:$8 sps:$4 sm:$0xff]  }
 0x18e   :  { %1175 = vmatprep.subr.bf16.mxu1 %v1792_v2  ;;  %v1831_v2 = vld [vmem:[#allocation8 + $0x1b4] ss:$8 sps:$4 sm:$0xff]  }
 0x191   :  { %1176 = vmatpush1.bf16.msra.mxu1 %v1790_v3  ;;  %v1829_v3 = vld [vmem:[#allocation8 + $0x1b0] ss:$8 sps:$4 sm:$0xff]  }
 0x192   :  { %1177 = vmatprep.subr.bf16.mxu1 %v1795_v4  ;;  %v1834_v4 = vld [vmem:[#allocation8 + $0x1c4] ss:$8 sps:$4 sm:$0xff]  }
 0x195   :  { %1178 = vmatpush1.bf16.msra.mxu1 %v1793_v5  ;;  %v1832_v5 = vld [vmem:[#allocation8 + $0x1c0] ss:$8 sps:$4 sm:$0xff]  }
 0x196   :  { %1188 = vmatprep.subr.bf16.mxu1 %v1798_v6  ;;  %v331_v6 = vsub.s32 2, %v2124_v22 }
 0x198   :  { %v332_v9 = vrot.slane %v2142_v19, %v331_v6  ;;  %v1859_v19 = vld [vmem:[#allocation10 + $0x38] sm:$0xff]  }
 0x199   :  { %1602 = vmatpush3.bf16.msra.mxu0 %v1859_v19 }
 0x22b   :  { %v695_v27 = vpop.f32.mrb[0].mxu1  ;;  %v2150_v28 = vpop.f32.mrb[4].mxu0 }
 0x22c   :  { %v696_v29 = vadd.f32 %v695_v27, %v324_v21  ;;  %v697_v30 = vpop.f32.mrb[1].mxu1  ;;  %v738_v31 = vpop.f32.mrb[5].mxu0  ;;  %v737_v12 = vadd.f32 %v2150_v28, %v332_v9  ;;  %v820_v21 = vrot.slane %v815_v20, %v2127_v23  ;;  %v1570_v23 = vld [vmem:[%s2189_s8] ss:$0 sm:$0xff] }
 0x22d   :  { %v698_v32 = vadd.f32 %v697_v30, %v328_v24  ;;  %v739_v33 = vadd.f32 %v738_v31, %v336_v26  ;;  %v699_v34 = vpop.f32.mrb[2].mxu1  ;;  %v740_v35 = vpop.f32.mrb[6].mxu0  ;;  %v824_v24 = vrot.slane %v815_v20, %v2133_v25 }
 0x22e   :  { %v743_v36 = vpack.c.bf16 %v696_v29, %v696_v29  ;;  %v700_v37 = vpop.f32.mrb[3].mxu1  ;;  %v741_v38 = vpop.f32.mrb[7].mxu0  ;;  %v745_v15 = vpack.c.bf16 %v737_v12, %v737_v12 }
 0x22f   :  { %v744_v39 = vpack.c.bf16 %v698_v32, %v698_v32  ;;  %v746_v40 = vpack.c.bf16 %v739_v33, %v739_v33 }
 0x230   :  { %v747_v43 = vmax.bf16 %v2011_v0, %v743_v36  ;;  %v749_v22 = vmax.bf16 %v2011_v0, %v745_v15 }
 0x231   :  { %v748_v41 = vmax.bf16 %v2011_v0, %v744_v39  ;;  %v750_v45 = vmax.bf16 %v2011_v0, %v746_v40 }
 0x233   :  { %1179 = vmatprep.mubr.bf16.mxu1 %v748_v41 }
 0x234   :  { %1180 = vmatmul.mubr.bf16.vlgmr.msra.gmra.mrb[4].mxu1 %v747_v43 }
 0x235   :  { %1189 = vmatpush1.bf16.msra.mxu1 %v1796_v42  ;;  %1220 = vmatprep.mubr.bf16.mxu1 %v750_v45 }
 0x236   :  { %1190 = vmatprep.subr.bf16.mxu1 %v1801_v44 }
 0x239   :  { %1191 = vmatpush1.bf16.msra.mxu1 %v1799_v46 }
 0x23a   :  { %1192 = vmatprep.subr.bf16.mxu1 %v1804_v47 }
 0x23d   :  { %1193 = vmatpush1.bf16.msra.mxu1 %v1802_v48 }
 0x23e   :  { %1194 = vmatprep.subr.bf16.mxu1 %v1807_v49 }
 0x241   :  { %1195 = vmatpush1.bf16.msra.mxu1 %v1805_v50 }
 0x242   :  { %1196 = vmatprep.subr.bf16.mxu1 %v1810_v51 }
 0x245   :  { %1197 = vmatpush1.bf16.msra.mxu1 %v1808_v52 }
 0x246   :  { %1198 = vmatprep.subr.bf16.mxu1 %v1813_v53 }
 0x249   :  { %1199 = vmatpush1.bf16.msra.mxu1 %v1811_v54 }
 0x24a   :  { %1200 = vmatprep.subr.bf16.mxu1 %v1816_v55 }
 0x24d   :  { %1201 = vmatpush1.bf16.msra.mxu1 %v1814_v56 }
 0x24e   :  { %1202 = vmatprep.subr.bf16.mxu1 %v1819_v57 }
 0x251   :  { %1203 = vmatpush1.bf16.msra.mxu1 %v1817_v58 }
 0x252   :  { %1204 = vmatprep.subr.bf16.mxu1 %v1822_v59 }
 0x255   :  { %1205 = vmatpush1.bf16.msra.mxu1 %v1820_v60 }
 0x256   :  { %1206 = vmatprep.subr.bf16.mxu1 %v1825_v61 }
 0x259   :  { %1207 = vmatpush1.bf16.msra.mxu1 %v1823_v62 }
 0x25a   :  { %1208 = vmatprep.subr.bf16.mxu1 %v1828_v63 }
 0x25d   :  { %1209 = vmatpush1.bf16.msra.mxu1 %v1826_v1 }
 0x25e   :  { %1210 = vmatprep.subr.bf16.mxu1 %v1831_v2 }
 0x261   :  { %1211 = vmatpush1.bf16.msra.mxu1 %v1829_v3 }
 0x262   :  { %1212 = vmatprep.subr.bf16.mxu1 %v1834_v4 }
 0x265   :  { %1213 = vmatpush1.bf16.msra.mxu1 %v1832_v5 }
 0x266   :  { %1214 = vmatprep.subr.bf16.mxu1 %v1837_v7 }
 0x269   :  { %1215 = vmatpush1.bf16.msra.mxu1 %v1835_v8 }
 0x26a   :  { %1216 = vmatprep.subr.bf16.mxu1 %v1840_v10 }
 0x26d   :  { %1217 = vmatpush1.bf16.msra.mxu1 %v1838_v11 }
 0x26e   :  { %1218 = vmatprep.subr.bf16.mxu1 %v1843_v13 }
 0x271   :  { %1219 = vmatpush1.bf16.msra.mxu1 %v1841_v14 }
 0x274   :  { %1221 = vmatmul.mubr.bf16.vlgmr.msra.gmra.mrb[4].mxu1 %v749_v22 }
 0x347   :  { %v1222_v26 = vpop.f32.mrb[4].mxu1 }
 0x348   :  { %v1609_v27 = vadd.f32 %v1222_v26, %v820_v21  ;;  %v1224_v28 = vpop.f32.mrb[5].mxu1 }
 0x349   :  { %v1610_v29 = vadd.f32 %v1224_v28, %v824_v24  ;;  %v1226_v30 = vpop.f32.mrb[6].mxu1 }
 0x34a   :  { %v1229_v31 = vpack.c.bf16 %v1609_v27, %v1609_v27  ;;  %v1227_v32 = vpop.f32.mrb[7].mxu1 }
 0x34b   :  { %v1230_v33 = vpack.c.bf16 %v1610_v29, %v1610_v29 }
 0x34c   :  { %v1231_v35 = vmax.bf16 %v2011_v0, %v1229_v31 }
 0x34d   :  { %v1232_v34 = vmax.bf16 %v2011_v0, %v1230_v33 }
 0x34f   :  { %1400 = vmatprep.mubr.bf16.mxu0 %v1232_v34 }
 0x350   :  { %1401 = vmatmul.mubr.bf16.vlgmr.msra.gmra.mrb[8].mxu0 %v1231_v35 }
 0x423   :  { %v1603_v36 = vpop.f32.mrb[8].mxu0 }
 0x424   :  { %v1604_v25 = vpop.f32.mrb[9].mxu0 }
 0x425   :  { %v1605_v37 = vadd.f32 %v1604_v25, %v1603_v36  ;;  %v1606_v38 = vpop.f32.mrb[10].mxu0 }
 0x426   :  { %v1607_v39 = vpop.f32.mrb[11].mxu0 }
 0x427   :  { %v1403_v40 = vadd.f32 %v1605_v37, %v1570_v23 }
 0x429   :  { %1408 = vst [vmem:[#allocation11] sm:$0xff] %v1403_v40 }
 0x42a   :  { %1981 = shalt.err (!%p1978_p2)
}
 0x42b   :  { %s1982_s8 = scalar_lea.hbm %s2190_s9, 128 }
 0x42c   :  { %p1983_p3 = scmp.ne.s32.totalorder %s2190_s9, %s1982_s8  ;;  %p1986_p4 = scmp.lt.u32.totalorder %s1982_s8, %s2190_s9 }
 0x42e   :  { %p1988_p5 = pnand %p1986_p4, %p1983_p3 }
 0x430   :  { %1991 = shalt.err (!%p1988_p5)
}
 0x431   :  { %1418 = dma.vmem_to_hbm [thread:$0]  %s1416_s13, 128, %s2190_s9, [#allocation4]  }
 0x432   :  { %1998 = dma.done.wait [#allocation4], 128  }
 0x433   :  { %1999 = vsyncadd [#allocation4], 4294967168 }
 0x434   :  { %1422 = vsyncpa [#allocation3], 1 }
 0x435   :  { %1423 = vsyncpa [#allocation6], 1 }
 0x436   :  { %1424 = vsyncpa [#allocation9], 1 }
 0x437   :  { %1425 = vsyncpa [#allocation4], 1 }

</bundles_post_ra>
